<compile_context>
chip_gen: v7x
topology: tpu7x:2x2x1
jax: 0.10.0
libtpu: 0.0.40
codegen_flags: <defaults>
</compile_context>

<pallas_src>
import functools

import jax
import jax.numpy as jnp
from jax.experimental import pallas as pl
from jax.experimental.pallas import tpu as pltpu


def _cdiv(a, b):
    return -(-a // b)


# ---------------------------------------------------------------------------
# Pallas kernel
# ---------------------------------------------------------------------------
def _haar_analysis_kernel(x_ref, o_ref, *, H, W):
    """All four Haar subbands for one (RBLK, H*W) row block.

    x_ref: (RBLK, H*W) VMEM input; each row is one (batch, channel) image with
           its (H, W) plane flattened into the lane axis.
    o_ref: (RBLK, 4*H*W) VMEM output; lanes [k*H*W, (k+1)*H*W) of a row hold
           subband k of that row (k in [ll, lh, hl, hh] order).

    Computes y_k[i, j] = sum_{a,b in {0,1}} w_k[a, b] * x[i-1+a, j-1+b]
    (zero padded, cropped to the leading (H, W) window) via the Haar butterfly.
    """
    HW = H * W
    # Fold the 0.25 filter scale into a single multiply of the (upcast) input.
    x = x_ref[...].astype(jnp.float32) * 0.25                     # (RBLK, HW)

    flat = jax.lax.broadcasted_iota(jnp.int32, x.shape, 1)        # i*W + j
    col_ok = (flat % W) != 0                                      # j >= 1
    row_ok = flat >= W                                            # i >= 1

    # Three independent XLU rolls of the scaled input (not serialized behind
    # the adds); masks kill the wrap-around / zero-padding positions.
    x_w = jnp.where(col_ok, pltpu.roll(x, shift=1, axis=1), 0.0)            # x[i, j-1]
    x_n = jnp.where(row_ok, pltpu.roll(x, shift=W, axis=1), 0.0)            # x[i-1, j]
    x_nw = jnp.where(col_ok & row_ok,
                     pltpu.roll(x, shift=W + 1, axis=1), 0.0)               # x[i-1, j-1]

    p_top = x_nw + x_n          # A + B   (top row of the 2x2 window)
    m_top = x_nw - x_n          # A - B
    p_bot = x_w + x             # C + D   (bottom row)
    m_bot = x_w - x             # C - D

    od = o_ref.dtype
    # Direct slice stores (static offsets, multiples of HW) — no concat temp,
    # writeback of each subband starts as soon as it is computed.
    o_ref[:, 0 * HW:1 * HW] = (p_top + p_bot).astype(od)   # ll
    o_ref[:, 1 * HW:2 * HW] = (m_top + m_bot).astype(od)   # lh
    o_ref[:, 2 * HW:3 * HW] = (p_top - p_bot).astype(od)   # hl
    o_ref[:, 3 * HW:4 * HW] = (m_top - m_bot).astype(od)   # hh


# ---------------------------------------------------------------------------
# Wrapper: block sizing + pallas_call
# ---------------------------------------------------------------------------
def haar_analysis_pallas(x):
    """Grouped 2x2 Haar analysis conv (padding=1, groups=C), cropped to (H, W).

    Returns coeffs of shape (B, 4*C, H, W) with channel 4*c + k = subband k of
    input channel c — exactly F.conv2d's grouped-output channel ordering.
    """
    B, C, H, W = x.shape
    HW = H * W
    R = B * C
    itemsize = jnp.dtype(x.dtype).itemsize

    x_flat = x.reshape(R, HW)                 # contiguous merges: free

    # ---- generation-aware VMEM budget --------------------------------------
    try:
        info = pltpu.get_tpu_info()
        vmem_cap = int(getattr(info, "vmem_capacity_bytes", 64 * 2**20))
    except Exception:
        vmem_cap = 64 * 2**20                 # conservative (v7x-sized) fallback
    # ~48 MiB on v7x (64 MiB physical), up to 96 MiB on v5e/v6e (128 MiB).
    budget = min((vmem_cap * 3) // 4, 96 * 2**20)

    # ---- bytes-based row-block selection -----------------------------------
    row_f32 = HW * 4
    # Per-row VMEM estimate: double-buffered in + out blocks (5 * block bytes)
    # in the I/O dtype, plus ~6 f32 temporaries' worth of live data.
    per_row = 2 * 5 * HW * itemsize + 6 * row_f32
    rblk = max(8, (2 * 2**20) // row_f32 // 8 * 8)       # aim ~2 MiB input blocks
    while rblk > 8 and rblk * per_row > budget:
        rblk -= 8
    if R <= rblk:
        rblk = R                                          # full dim: always legal
    steps = _cdiv(R, rblk)
    # v7x megacore: prefer an even number of grid steps so both cores stay busy.
    if steps > 1 and steps % 2 == 1 and rblk > 8:
        alt = _cdiv(_cdiv(R, steps + 1), 8) * 8
        if 8 <= alt < rblk:
            rblk = alt
            steps = _cdiv(R, rblk)

    vmem_limit = int(min(budget, max(16 * 2**20, 2 * rblk * per_row)))

    cost = pl.CostEstimate(
        flops=13 * R * HW,                     # 1 mul + 12 add/sub per input elem
        transcendentals=0,
        bytes_accessed=(1 + 4) * R * HW * itemsize)

    kernel = functools.partial(_haar_analysis_kernel, H=H, W=W)
    y = pl.pallas_call(
        kernel,
        out_shape=jax.ShapeDtypeStruct((R, 4 * HW), x.dtype),
        grid=(steps,),
        in_specs=[pl.BlockSpec((rblk, HW), lambda r: (r, 0))],
        out_specs=pl.BlockSpec((rblk, 4 * HW), lambda r: (r, 0)),
        compiler_params=pltpu.CompilerParams(
            dimension_semantics=("parallel",),
            vmem_limit_bytes=vmem_limit),
        cost_estimate=cost,
    )(x_flat)

    # (B*C, 4*H*W) -> (B, 4*C, H, W): pure row-major relabeling (no data
    # movement); channel 4*c + k lands exactly where the grouped conv puts it.
    return y.reshape(B, 4 * C, H, W)


# ---------------------------------------------------------------------------
# Pure-JAX reference (same semantics, for validation)
# ---------------------------------------------------------------------------
def _haar_filters():
    h = jnp.array([0.5, 0.5], dtype=jnp.float32)
    g = jnp.array([0.5, -0.5], dtype=jnp.float32)
    return jnp.stack([jnp.outer(h, h), jnp.outer(h, g),
                      jnp.outer(g, h), jnp.outer(g, g)], axis=0)   # (4, 2, 2)


def haar_analysis_ref(x):
    B, C, H, W = x.shape
    w = jnp.tile(_haar_filters(), (C, 1, 1))[:, None, :, :]        # (4C, 1, 2, 2)
    y = jax.lax.conv_general_dilated(
        x, w, window_strides=(1, 1), padding=((1, 1), (1, 1)),
        dimension_numbers=("NCHW", "OIHW", "NCHW"),
        feature_group_count=C, precision=jax.lax.Precision.HIGHEST)
    return y[:, :, :H, :W]            # assumed match_spatial_dims crop


# ---------------------------------------------------------------------------
# Module wrapper (forward / split only)
# ---------------------------------------------------------------------------
class StationaryHaarSplitMergePallas:
    """Pallas port of StationaryHaarSplitMerge.forward."""

    def __init__(self, in_channels: int = 1):
        self.h = 1                    # coarse_to_in_ch_ratio (fixed in the module)
        self.in_ch = in_channels
        self.pad = 1

    def _split(self, coeffs, C):
        # Per-batch contiguous channel slices; fuse into consumers under jit.
        return coeffs[:, : self.h * C], coeffs[:, self.h * C:]

    def __call__(self, x):
        B, C, H, W = x.shape
        if C != self.in_ch:
            raise ValueError(f"Expected {self.in_ch} channels, got {C}.")
        coeffs = haar_analysis_pallas(x)
        return self._split(coeffs, C)

    def reference(self, x):
        B, C, H, W = x.shape
        if C != self.in_ch:
            raise ValueError(f"Expected {self.in_ch} channels, got {C}.")
        coeffs = haar_analysis_ref(x)
        return self._split(coeffs, C)


if __name__ == "__main__":
    key = jax.random.PRNGKey(0)
    B, C, H, W = 2, 4, 16, 16
    x = jax.random.normal(key, (B, C, H, W), dtype=jnp.float32)

    model = StationaryHaarSplitMergePallas(in_channels=C)
    x_coarse, x_detail = model(x)
    x_coarse = jax.block_until_ready(x_coarse)
    x_detail = jax.block_until_ready(x_detail)

    assert x_coarse.shape == (B, 1 * C, H, W), x_coarse.shape
    assert x_detail.shape == (B, 3 * C, H, W), x_detail.shape
    assert x_coarse.dtype == jnp.float32 and x_detail.dtype == jnp.float32

    # Validate against the pure-JAX grouped-conv reference (same crop assumption).
    rc, rd = model.reference(x)
    assert jnp.allclose(x_coarse, rc, atol=1e-5, rtol=1e-5), \
        float(jnp.max(jnp.abs(x_coarse - rc)))
    assert jnp.allclose(x_detail, rd, atol=1e-5, rtol=1e-5), \
        float(jnp.max(jnp.abs(x_detail - rd)))

    print("KERNEL_OK")
</pallas_src>

<mosaic_0001>
module attributes {stable_mosaic.version = 11 : i64} {
  func.func @_haar_analysis_kernel(%arg0: i32, %arg1: memref<8x256xf32, #tpu.memory_space<vmem>>, %arg2: memref<8x1024xf32, #tpu.memory_space<vmem>>) attributes {dimension_semantics = [#tpu.dimension_semantics<parallel>], iteration_bounds = array<i64: 1>, scalar_prefetch = 0 : i64, scratch_operands = 0 : i64, tpu.core_type = #tpu.core_type<tc>, window_params = [{transform_indices = @transform_0, window_bounds = array<i64: 8, 256>}, {transform_indices = @transform_1, window_bounds = array<i64: 8, 1024>}]} {
    %c0 = arith.constant 0 : index
    %c0_0 = arith.constant 0 : index
    %0 = vector.load %arg1[%c0, %c0_0] : memref<8x256xf32, #tpu.memory_space<vmem>>, vector<8x256xf32>
    %cst = arith.constant 2.500000e-01 : f32
    %1 = vector.broadcast %cst : f32 to vector<8x256xf32>
    %2 = arith.mulf %0, %1 : vector<8x256xf32>
    %3 = tpu.iota {dimensions = array<i32: 1>} : vector<8x256xi32>
    %c16_i32 = arith.constant 16 : i32
    %c0_i32 = arith.constant 0 : i32
    %4 = arith.cmpi eq, %c16_i32, %c0_i32 : i32
    %c1_i32 = arith.constant 1 : i32
    %5 = arith.select %4, %c1_i32, %c16_i32 : i32
    %6 = vector.broadcast %5 : i32 to vector<8x256xi32>
    %7 = arith.remsi %3, %6 : vector<8x256xi32>
    %c0_i32_1 = arith.constant 0 : i32
    %8 = vector.broadcast %c0_i32_1 : i32 to vector<8x256xi32>
    %9 = arith.cmpi ne, %7, %8 : vector<8x256xi32>
    %c0_i32_2 = arith.constant 0 : i32
    %10 = vector.broadcast %c0_i32_2 : i32 to vector<8x256xi32>
    %11 = arith.cmpi slt, %7, %10 : vector<8x256xi32>
    %c0_i32_3 = arith.constant 0 : i32
    %12 = arith.cmpi slt, %5, %c0_i32_3 : i32
    %13 = vector.broadcast %12 : i1 to vector<8x256xi1>
    %14 = vector.broadcast %13 : vector<8x256xi1> to vector<8x256xi1>
    %15 = arith.xori %11, %14 : vector<8x256xi1>
    %16 = arith.andi %15, %9 : vector<8x256xi1>
    %17 = vector.broadcast %5 : i32 to vector<8x256xi32>
    %18 = arith.addi %7, %17 : vector<8x256xi32>
    %19 = arith.select %16, %18, %7 : vector<8x256xi1>, vector<8x256xi32>
    %c0_i32_4 = arith.constant 0 : i32
    %20 = vector.broadcast %c0_i32_4 : i32 to vector<8x256xi32>
    %21 = arith.cmpi ne, %19, %20 : vector<8x256xi32>
    %c16_i32_5 = arith.constant 16 : i32
    %22 = vector.broadcast %c16_i32_5 : i32 to vector<8x256xi32>
    %23 = arith.cmpi sge, %3, %22 : vector<8x256xi32>
    %c1_i32_6 = arith.constant 1 : i32
    %24 = tpu.dynamic_rotate %2 by %c1_i32_6 dim 1 : vector<8x256xf32>, i32 -> vector<8x256xf32>
    %cst_7 = arith.constant 0.000000e+00 : f32
    %25 = vector.broadcast %cst_7 : f32 to vector<8x256xf32>
    %26 = arith.select %21, %24, %25 : vector<8x256xi1>, vector<8x256xf32>
    %c16_i32_8 = arith.constant 16 : i32
    %27 = tpu.dynamic_rotate %2 by %c16_i32_8 dim 1 : vector<8x256xf32>, i32 -> vector<8x256xf32>
    %cst_9 = arith.constant 0.000000e+00 : f32
    %28 = vector.broadcast %cst_9 : f32 to vector<8x256xf32>
    %29 = arith.select %23, %27, %28 : vector<8x256xi1>, vector<8x256xf32>
    %30 = arith.andi %21, %23 : vector<8x256xi1>
    %c17_i32 = arith.constant 17 : i32
    %31 = tpu.dynamic_rotate %2 by %c17_i32 dim 1 : vector<8x256xf32>, i32 -> vector<8x256xf32>
    %cst_10 = arith.constant 0.000000e+00 : f32
    %32 = vector.broadcast %cst_10 : f32 to vector<8x256xf32>
    %33 = arith.select %30, %31, %32 : vector<8x256xi1>, vector<8x256xf32>
    %34 = arith.addf %33, %29 : vector<8x256xf32>
    %35 = arith.subf %33, %29 : vector<8x256xf32>
    %36 = arith.addf %26, %2 : vector<8x256xf32>
    %37 = arith.subf %26, %2 : vector<8x256xf32>
    %38 = arith.addf %34, %36 : vector<8x256xf32>
    %c0_11 = arith.constant 0 : index
    %c0_12 = arith.constant 0 : index
    %39 = vector.load %arg2[%c0_11, %c0_12] : memref<8x1024xf32, #tpu.memory_space<vmem>>, vector<8x256xf32>
    tpu.vector_store %arg2[%c0_11, %c0_12], %38 {strides = array<i32>} : memref<8x1024xf32, #tpu.memory_space<vmem>>, vector<8x256xf32>,
    %40 = arith.addf %35, %37 : vector<8x256xf32>
    %c0_13 = arith.constant 0 : index
    %c256 = arith.constant 256 : index
    %41 = vector.load %arg2[%c0_13, %c256] : memref<8x1024xf32, #tpu.memory_space<vmem>>, vector<8x256xf32>
    tpu.vector_store %arg2[%c0_13, %c256], %40 {strides = array<i32>} : memref<8x1024xf32, #tpu.memory_space<vmem>>, vector<8x256xf32>,
    %42 = arith.subf %34, %36 : vector<8x256xf32>
    %c0_14 = arith.constant 0 : index
    %c512 = arith.constant 512 : index
    %43 = vector.load %arg2[%c0_14, %c512] : memref<8x1024xf32, #tpu.memory_space<vmem>>, vector<8x256xf32>
    tpu.vector_store %arg2[%c0_14, %c512], %42 {strides = array<i32>} : memref<8x1024xf32, #tpu.memory_space<vmem>>, vector<8x256xf32>,
    %44 = arith.subf %35, %37 : vector<8x256xf32>
    %c0_15 = arith.constant 0 : index
    %c768 = arith.constant 768 : index
    %45 = vector.load %arg2[%c0_15, %c768] : memref<8x1024xf32, #tpu.memory_space<vmem>>, vector<8x256xf32>
    tpu.vector_store %arg2[%c0_15, %c768], %44 {strides = array<i32>} : memref<8x1024xf32, #tpu.memory_space<vmem>>, vector<8x256xf32>,
    return
  }
  func.func @transform_0(%arg0: i32) -> (i32, i32) {
    %c0_i32 = arith.constant 0 : i32
    %c0_i32_0 = arith.constant 0 : i32
    return %arg0, %c0_i32 : i32, i32
  }
  func.func @transform_1(%arg0: i32) -> (i32, i32) {
    %c0_i32 = arith.constant 0 : i32
    %c0_i32_0 = arith.constant 0 : i32
    return %arg0, %c0_i32 : i32, i32
  }
}

</mosaic_0001>

<bundles_post_ra>
// kernel: tpu_custom_call.1
= control target key start
LH: loop header
LB: loop body
LE: loop exit
PB: predicated region body
PF: predicated region fallthrough
CT: control target
= control target key end

     0   :  { %6 = vsyncpa [#allocation3], 0  ;;  %s224_s0 = inlined_call_operand.hbm [shape: f32[8,256], index: 0, kind: input, shape index: {}]   ;;  %s225_s1 = inlined_call_operand.hbm [shape: f32[8,1024], index: 1, kind: output, shape index: {}]  }
   0x1   :  { %7 = vsyncpa [#allocation4], 0  ;;  %s177_s6 = smov [#allocation2]   ;;  %s129_s10 = scalar_lea.hbm %s224_s0, 256 }
   0x2   :  { %s14_s7 = sshll.u32 %s177_s6, 4  ;;  %p130_p0 = scmp.ne.s32.totalorder %s224_s0, %s129_s10  ;;  %s15_s7 = int_to_ptr.vmem [resolvable:$true] %s14_s7 }
   0x3   :  { %p133_p1 = scmp.lt.u32.totalorder %s129_s10, %s224_s0 }
   0x5   :  { %p135_p2 = pnand %p133_p1, %p130_p0 }
   0x7   :  { %138 = shalt.err (!%p135_p2)
}
   0x8   :  { %s139_s15 = scalar_lea.vmem %s15_s7, 256  ;;  %p144_p4 = scmp.lt.s32.totalorder %s15_s7, %s15_s7 }
   0x9   :  { %p140_p3 = scmp.ne.s32.totalorder %s15_s7, %s139_s15  ;;  %p145_p5 = scmp.lt.s32.totalorder %s139_s15, %s139_s15 }
   0xb   :  { %p146_p6 = por %p145_p5, %p144_p4 }
   0xd   :  { %p147_p7 = pnand %p146_p6, %p140_p3 }
   0xf   :  { %150 = shalt.err (!%p147_p7)
}
  0x10   :  { %17 = dma.hbm_to_vmem [thread:$0]  %s224_s0, 256, %s15_s7, [#allocation3]  }
  0x11   :  { %173 = dma.done.wait [#allocation3], 256  }
  0x12   :  { %174 = vsyncadd [#allocation3], 4294967040  ;;  %v21_v0 = vld [vmem:[#allocation2] sm:$0xff]  ;;  %v22_v1 = vld [vmem:[#allocation2 + $0x8] sm:$0xff]  ;;  %s178_s18 = smov 16   ;;  %s179_s19 = smov 1   ;;  %v25_v4 = vlaneseq }
  0x13   :  { %v23_v2 = vmul.f32 0.25, %v21_v0  ;;  %v24_v3 = vmul.f32 0.25, %v22_v1  ;;  %s180_s20 = smov 17   ;;  %s181_s0 = smov [#allocation5]  }
  0x14   :  { %v26_v5 = vand.u32 127, %v25_v4  ;;  %s115_s21 = sshll.u32 %s181_s0, 4  ;;  %s116_s21 = int_to_ptr.vmem [resolvable:$true] %s115_s21 }
  0x15   :  { %65 = vrot.lane.b32.xlu1 %v23_v2, %s178_s18  ;;  %56 = vrot.lane.b32.xlu0 %v23_v2, %s179_s19  ;;  %s151_s22 = scalar_lea.vmem %s116_s21, 1024  ;;  %p156_p9 = scmp.lt.s32.totalorder %s116_s21, %s116_s21 }
  0x16   :  { %v27_v6 = vadd.s32 128, %v26_v5  ;;  %v32_v7 = vand.u32 15, %v26_v5  ;;  %vm69_vm0 = vcmp.lt.s32.totalorder %v26_v5, 16  ;;  %vm60_vm1 = vcmp.lt.s32.totalorder %v26_v5, 1  ;;  %p152_p8 = scmp.ne.s32.totalorder %s116_s21, %s151_s22  ;;  %p157_p10 = scmp.lt.s32.totalorder %s151_s22, %s151_s22 }
  0x17   :  { %vm54_vm4 = vcmp.ge.s32.totalorder %v26_v5, 16  ;;  %vm80_vm5 = vcmp.lt.s32.totalorder %v26_v5, 17 }
  0x18   :  { %v39_v8 = vand.u32 15, %v27_v6  ;;  %vm52_vm2 = vcmp.ne.s32.totalorder %v32_v7, 0  ;;  %p158_p11 = por %p157_p10, %p156_p9 }
  0x19   :  { %67 = vrot.lane.b32.xlu1 %v24_v3, %s178_s18  ;;  %58 = vrot.lane.b32.xlu0 %v24_v3, %s179_s19  ;;  %vm74_vm6 = vmand %vm52_vm2, %vm54_vm4 }
  0x1a   :  { %vm204_vm3 = vcmp.ne.s32.totalorder %v39_v8, 0  ;;  %p159_p12 = pnand %p158_p11, %p152_p8 }
  0x1d   :  { %78 = vrot.lane.b32.xlu1 %v24_v3, %s180_s20  ;;  %76 = vrot.lane.b32.xlu0 %v23_v2, %s180_s20 }
  0x87   :  { %v66_v9 = vpop.permute.xlu1 %65  ;;  %v57_v10 = vpop.permute.xlu0 %56 }
  0x8b   :  { %v68_v12 = vpop.permute.xlu1 %67  ;;  %v59_v13 = vpop.permute.xlu0 %58 }
  0x8c   :  { %v71_v14 = vsel %vm69_vm0, %v68_v12, %v66_v9  ;;  %v61_v15 = vsel %vm60_vm1, %v57_v10, %v59_v13  ;;  %v62_v16 = vsel %vm60_vm1, %v59_v13, %v57_v10  ;;  %v70_v19 = vsel %vm69_vm0, %v66_v9, %v68_v12 }
  0x8d   :  { %v63_v17 = vsel %vm52_vm2, %v62_v16, 0.0  ;;  %v64_v18 = vsel %vm204_vm3, %v61_v15, 0.0  ;;  %v72_v20 = vsel %vm54_vm4, %v71_v14, 0.0 }
  0x8e   :  { %v89_v23 = vadd.f32 %v63_v17, %v23_v2  ;;  %v90_v24 = vadd.f32 %v64_v18, %v24_v3  ;;  %v91_v27 = vsub.f32 %v63_v17, %v23_v2  ;;  %v92_v28 = vsub.f32 %v64_v18, %v24_v3 }
  0x8f   :  { %v79_v21 = vpop.permute.xlu1 %78  ;;  %v77_v22 = vpop.permute.xlu0 %76 }
  0x90   :  { %v81_v25 = vsel %vm80_vm5, %v77_v22, %v79_v21  ;;  %v82_v26 = vsel %vm80_vm5, %v79_v21, %v77_v22 }
  0x91   :  { %v83_v29 = vsel %vm74_vm6, %v82_v26, 0.0  ;;  %v84_v30 = vsel %vm204_vm3, %v81_v25, 0.0 }
  0x92   :  { %v85_v31 = vadd.f32 %v83_v29, %v72_v20  ;;  %v86_v32 = vadd.f32 %v84_v30, %v70_v19  ;;  %v87_v33 = vsub.f32 %v83_v29, %v72_v20  ;;  %v88_v34 = vsub.f32 %v84_v30, %v70_v19 }
  0x94   :  { %v93_v35 = vadd.f32 %v89_v23, %v85_v31  ;;  %v94_v36 = vadd.f32 %v90_v24, %v86_v32  ;;  %v97_v37 = vadd.f32 %v91_v27, %v87_v33  ;;  %v98_v38 = vadd.f32 %v92_v28, %v88_v34 }
  0x95   :  { %v101_v39 = vsub.f32 %v85_v31, %v89_v23  ;;  %v102_v40 = vsub.f32 %v86_v32, %v90_v24  ;;  %v105_v41 = vsub.f32 %v87_v33, %v91_v27  ;;  %v106_v42 = vsub.f32 %v88_v34, %v92_v28 }
  0x96   :  { %95 = vst [vmem:[#allocation5] sm:$0xff] %v93_v35  ;;  %96 = vst [vmem:[#allocation5 + $0x8] sm:$0xff] %v94_v36 }
  0x97   :  { %99 = vst [vmem:[#allocation5 + $0x10] sm:$0xff] %v97_v37  ;;  %100 = vst [vmem:[#allocation5 + $0x18] sm:$0xff] %v98_v38 }
  0x98   :  { %103 = vst [vmem:[#allocation5 + $0x20] sm:$0xff] %v101_v39  ;;  %104 = vst [vmem:[#allocation5 + $0x28] sm:$0xff] %v102_v40 }
  0x99   :  { %107 = vst [vmem:[#allocation5 + $0x30] sm:$0xff] %v105_v41  ;;  %108 = vst [vmem:[#allocation5 + $0x38] sm:$0xff] %v106_v42 }
  0x9a   :  { %162 = shalt.err (!%p159_p12)
}
  0x9b   :  { %s163_s25 = scalar_lea.hbm %s225_s1, 1024 }
  0x9c   :  { %p164_p13 = scmp.ne.s32.totalorder %s225_s1, %s163_s25  ;;  %p167_p0 = scmp.lt.u32.totalorder %s163_s25, %s225_s1 }
  0x9e   :  { %p169_p1 = pnand %p167_p0, %p164_p13 }
  0xa0   :  { %172 = shalt.err (!%p169_p1)
}
  0xa1   :  { %118 = dma.vmem_to_hbm [thread:$0]  %s116_s21, 1024, %s225_s1, [#allocation4]  }
  0xa2   :  { %175 = dma.done.wait [#allocation4], 1024  }
  0xa3   :  { %176 = vsyncadd [#allocation4], 4294966272 }
  0xa4   :  { %122 = vsyncpa [#allocation3], 1 }
  0xa5   :  { %123 = vsyncpa [#allocation4], 1 }

</bundles_post_ra>
